<compile_context>
chip_gen: v7x
topology: tpu7x:2x2x1
jax: 0.10.0
libtpu: 0.0.40
codegen_flags: <defaults>
</compile_context>

<pallas_src>
import functools

import jax
import jax.numpy as jnp
from jax import lax
from jax.experimental import pallas as pl
from jax.experimental.pallas import tpu as pltpu


def _hswish(v):
    # x * relu6(x + 3) / 6
    return v * jnp.clip(v + 3.0, 0.0, 6.0) * (1.0 / 6.0)


def _sigmoid(v):
    # sigmoid(v) == (1 + tanh(v/2)) / 2 : a single (accurate) EUP transcendental.
    return 0.5 * jnp.tanh(0.5 * v) + 0.5


def _attention(ycat, w1_ref, b1_ref, w2_ref, b2_ref, w3_ref, b3_ref, h, out_dtype):
    """Tiny per-(H+W) attention math (all f32).  ycat: (C, H+W) f32."""
    y = jnp.dot(w1_ref[...], ycat, preferred_element_type=jnp.float32) + b1_ref[...]
    y = _hswish(y)                                                          # (mip, H+W)
    # conv2 only on the H branch, conv3 only on the W branch (no wasted halves).
    ah = _sigmoid(jnp.dot(w2_ref[...], y[:, :h],
                          preferred_element_type=jnp.float32) + b2_ref[...])  # (C, H)
    aw = _sigmoid(jnp.dot(w3_ref[...], y[:, h:],
                          preferred_element_type=jnp.float32) + b3_ref[...])  # (C, W)
    return ah.astype(out_dtype), aw.astype(out_dtype)


# ---------------------------------------------------------------------------
# One-pass kernel, flat (N, C, H*W) layout (used when W < 128: lane-dense HW).
# ---------------------------------------------------------------------------
def _coordatt_flat_kernel(x_ref, e_ref, psc_ref, w1_ref, b1_ref, w2_ref, b2_ref,
                          w3_ref, b3_ref, o_ref, *, h):
    x = x_ref[0]                                     # (C, HW), native dtype (never upcast)
    # Fused coordinate pooling: one transposed-B matmul against the shared
    # (H+W, HW) indicator, contracting the lane-dense HW axis, f32 accumulate.
    ycat = lax.dot_general(x, e_ref[...],
                           dimension_numbers=(((1,), (1,)), ((), ())),
                           preferred_element_type=jnp.float32)             # (C, H+W)
    ycat = ycat * psc_ref[...]                       # fold 1/W, 1/H (tiny VPU op)
    ah, aw = _attention(ycat, w1_ref, b1_ref, w2_ref, b2_ref, w3_ref, b3_ref,
                        h, x.dtype)
    # Broadcast the attention vectors back onto the flat spatial axis (MXU).
    # Each column of E has exactly one nonzero (== 1), so this is exact at the
    # narrow dtype -> materialize the two (C, HW) slabs in x.dtype.
    ahe = jnp.dot(ah, e_ref[:h, :], preferred_element_type=x.dtype)        # (C, HW)
    awe = jnp.dot(aw, e_ref[h:, :], preferred_element_type=x.dtype)        # (C, HW)
    o_ref[0] = (x * awe * ahe).astype(o_ref.dtype)


# ---------------------------------------------------------------------------
# One-pass kernel, (N, C, H, W) layout (used when W >= 128: already lane-dense).
# No indicator constants; pooling = reductions, apply = broadcasting.
# ---------------------------------------------------------------------------
def _coordatt_reduce_kernel(x_ref, w1_ref, b1_ref, w2_ref, b2_ref, w3_ref, b3_ref,
                            o_ref):
    x = x_ref[0]                                     # (C, H, W), native dtype
    h = x.shape[1]
    xh = jnp.mean(x, axis=2, dtype=jnp.float32)      # (C, H): lane reduce
    xw = jnp.mean(x, axis=1, dtype=jnp.float32)      # (C, W): sublane reduce
    ycat = jnp.concatenate([xh, xw], axis=1)         # (C, H+W)
    ah, aw = _attention(ycat, w1_ref, b1_ref, w2_ref, b2_ref, w3_ref, b3_ref,
                        h, x.dtype)
    o_ref[0] = (x * aw[:, None, :] * ah[:, :, None]).astype(o_ref.dtype)


# ---------------------------------------------------------------------------
# Two-pass fallback: tiled elementwise apply kernel (pass 2).
# ---------------------------------------------------------------------------
def _apply_kernel(x_ref, ah_ref, aw_ref, o_ref):
    x = x_ref[0]                                     # (Ct, H, W)
    ah = ah_ref[0]                                   # (Ct, H)
    aw = aw_ref[0]                                   # (Ct, W)
    o_ref[0] = (x * aw[:, None, :] * ah[:, :, None]).astype(o_ref.dtype)


# ---------------------------------------------------------------------------
# Helpers
# ---------------------------------------------------------------------------
def _vmem_capacity_bytes():
    try:
        return int(pltpu.get_tpu_info().vmem_capacity_bytes)
    except Exception:
        pass
    kind = ""
    try:
        kind = jax.devices()[0].device_kind.lower()
    except Exception:
        pass
    if "v5" in kind or "v6" in kind:
        return 128 * 1024 * 1024
    # Conservative default (v7x-sized); an underestimate only pushes large shapes
    # onto the safe two-pass path instead of over-subscribing VMEM.
    return 64 * 1024 * 1024


def _const_spec(shape, single_buffer):
    nd = len(shape)
    idx = lambda *args, _nd=nd: (0,) * _nd
    if single_buffer:
        # Grid-invariant constants are DMA'd once; single-buffer them to halve
        # the VMEM they reserve (guarded by a fallback at the call site).
        return pl.BlockSpec(shape, idx, pipeline_mode=pl.Buffered(1))
    return pl.BlockSpec(shape, idx)


def _fold_params(params, eps):
    """Fold BatchNorm (running stats / eval mode) into conv1; cast weights to f32."""
    w1, b1, gamma, beta, rmean, rvar, w2, b2, w3, b3 = params
    scale = gamma * lax.rsqrt(rvar + eps)                           # (mip, 1)
    w1f = (w1 * scale).astype(jnp.float32)                          # (mip, C)
    b1f = (b1 * scale + beta - rmean * scale).astype(jnp.float32)   # (mip, 1)
    return (w1f, b1f, w2.astype(jnp.float32), b2.astype(jnp.float32),
            w3.astype(jnp.float32), b3.astype(jnp.float32))


def _choose_channel_tile(c, h, w, itemsize, budget_bytes=2 << 20):
    # Candidate tiles keep the (8,128) rule valid for the (1,Ct,H)/(1,Ct,W)
    # attention blocks: either the full C, or a multiple of 8 that divides C.
    cands = [d for d in range(c, 0, -1) if c % d == 0 and (d == c or d % 8 == 0)]
    for d in cands:
        if d * h * w * itemsize <= budget_bytes:
            return d
    return cands[-1]


def _coord_att_two_pass(x, weights, h, w):
    """Pass 1 (XLA): tiny attention vectors.  Pass 2 (Pallas): tiled apply.

    Used when the one-block-per-batch kernel would not fit VMEM (v7x's 64 MiB at
    large C*H*W) or when forced.  Both apply-grid axes are 'parallel' so v7x's
    two TensorCores are busy even at batch == 1.
    """
    w1f, b1f, w2f, b2f, w3f, b3f = weights
    n, c = x.shape[0], x.shape[1]
    xh = jnp.mean(x, axis=3, dtype=jnp.float32)                     # (N, C, H)
    xw = jnp.mean(x, axis=2, dtype=jnp.float32)                     # (N, C, W)
    y = jnp.concatenate([xh, xw], axis=2)                           # (N, C, H+W)
    y = jnp.einsum('mc,ncl->nml', w1f, y) + b1f[None]
    y = _hswish(y)
    ah = jax.nn.sigmoid(jnp.einsum('om,nmh->noh', w2f, y[:, :, :h]) + b2f[None])
    aw = jax.nn.sigmoid(jnp.einsum('om,nmw->now', w3f, y[:, :, h:]) + b3f[None])
    ah = ah.astype(x.dtype)                                         # (N, C, H)
    aw = aw.astype(x.dtype)                                         # (N, C, W)

    itemsize = jnp.dtype(x.dtype).itemsize
    ct = _choose_channel_tile(c, h, w, itemsize)
    grid = (n, c // ct)
    return pl.pallas_call(
        _apply_kernel,
        out_shape=jax.ShapeDtypeStruct((n, c, h, w), x.dtype),
        grid_spec=pltpu.PrefetchScalarGridSpec(
            num_scalar_prefetch=0, grid=grid,
            in_specs=[pl.BlockSpec((1, ct, h, w), lambda i, j: (i, j, 0, 0)),
                      pl.BlockSpec((1, ct, h), lambda i, j: (i, j, 0)),
                      pl.BlockSpec((1, ct, w), lambda i, j: (i, j, 0))],
            out_specs=pl.BlockSpec((1, ct, h, w), lambda i, j: (i, j, 0, 0))),
        compiler_params=pltpu.CompilerParams(
            dimension_semantics=("parallel", "parallel")),
    )(x, ah, aw)


# ---------------------------------------------------------------------------
# Public entry point
# ---------------------------------------------------------------------------
def coord_att(x, params, eps=1e-5, force_path=None):
    """CoordAtt forward.  force_path in {None, 'flat', 'reduce', 'two_pass'}."""
    n, c, h, w = x.shape
    hw = h * w
    itemsize = jnp.dtype(x.dtype).itemsize

    weights = _fold_params(params, eps)
    w1f, b1f, w2f, b2f, w3f, b3f = weights
    mip, oup = w1f.shape[0], w2f.shape[0]
    assert oup == c, "CoordAtt requires oup == inp for the final elementwise product"

    wbytes = sum(int(t.size) * 4 for t in weights)
    cap = _vmem_capacity_bytes()
    ebytes = (h + w) * hw * itemsize        # shared indicator matrix (flat path only)

    def _need(variant):
        # x + out double-buffered + attention slabs / temporaries + constants.
        base = 7 * c * hw * itemsize + wbytes + (4 << 20)
        if variant == "flat":
            base += 2 * ebytes              # budget double-buffered even with Buffered(1)
        return base

    if force_path is None:
        variant = "reduce" if w >= 128 else "flat"
        if _need(variant) > int(cap * 0.85):
            variant = "two_pass"            # explicit fallback instead of a silent clamp
    else:
        variant = force_path
    if variant not in ("flat", "reduce", "two_pass"):
        raise ValueError(f"unknown force_path: {force_path!r}")

    if variant == "two_pass":
        return _coord_att_two_pass(x, weights, h, w)

    need = _need(variant)
    vmem_limit = int(min(max(need, 32 << 20), int(cap * 0.9)))
    cparams = pltpu.CompilerParams(dimension_semantics=("parallel",),
                                   vmem_limit_bytes=vmem_limit)

    conv_flops = 2 * mip * c * (h + w) + 2 * oup * mip * (h + w)
    if variant == "flat":
        flops = n * (4 * c * hw * (h + w) + conv_flops + 4 * c * hw)
        bytes_accessed = 2 * n * c * hw * itemsize + ebytes + wbytes
    else:
        flops = n * (conv_flops + 6 * c * hw)
        bytes_accessed = 2 * n * c * hw * itemsize + wbytes
    cost = pl.CostEstimate(flops=int(flops),
                           transcendentals=int(n * oup * (h + w)),
                           bytes_accessed=int(bytes_accessed))

    if variant == "reduce":
        def call(single_buffer):
            in_specs = [pl.BlockSpec((1, c, h, w), lambda i: (i, 0, 0, 0))]
            in_specs += [_const_spec(t.shape, single_buffer) for t in weights]
            return pl.pallas_call(
                _coordatt_reduce_kernel,
                out_shape=jax.ShapeDtypeStruct((n, c, h, w), x.dtype),
                grid_spec=pltpu.PrefetchScalarGridSpec(
                    num_scalar_prefetch=0, grid=(n,),
                    in_specs=in_specs,
                    out_specs=pl.BlockSpec((1, c, h, w), lambda i: (i, 0, 0, 0))),
                compiler_params=cparams, cost_estimate=cost,
            )(x, *weights)

        try:
            return call(True)
        except Exception:
            return call(False)

    # "flat" variant: (N, C, H*W) lane-dense layout + single shared indicator.
    # The indicator follows x.dtype, so bf16 inputs get bf16-rate MXU matmuls;
    # f32 inputs keep f32 indicators to preserve the accuracy of the means.
    p = jnp.arange(hw)
    e = jnp.concatenate(
        [(p[None, :] // w == jnp.arange(h)[:, None]),     # rows 0..H-1 : W-pool / H-bcast
         (p[None, :] % w == jnp.arange(w)[:, None])],     # rows H..H+W-1: H-pool / W-bcast
        axis=0).astype(x.dtype)                                               # (H+W, HW)
    psc = jnp.concatenate([jnp.full((1, h), 1.0 / w, jnp.float32),
                           jnp.full((1, w), 1.0 / h, jnp.float32)], axis=1)   # (1, H+W)

    x3 = x.reshape(n, c, hw)                          # free, contiguous reshape
    consts = (e, psc) + weights
    kernel = functools.partial(_coordatt_flat_kernel, h=h)

    def call(single_buffer):
        in_specs = [pl.BlockSpec((1, c, hw), lambda i: (i, 0, 0))]
        in_specs += [_const_spec(t.shape, single_buffer) for t in consts]
        out3 = pl.pallas_call(
            kernel,
            out_shape=jax.ShapeDtypeStruct((n, c, hw), x.dtype),
            grid_spec=pltpu.PrefetchScalarGridSpec(
                num_scalar_prefetch=0, grid=(n,),
                in_specs=in_specs,
                out_specs=pl.BlockSpec((1, c, hw), lambda i: (i, 0, 0))),
            compiler_params=cparams, cost_estimate=cost,
        )(x3, *consts)
        return out3.reshape(n, c, h, w)

    try:
        return call(True)
    except Exception:
        return call(False)


# ---------------------------------------------------------------------------
# Pure-JAX reference (same math as the PyTorch module, BN in eval mode).
# ---------------------------------------------------------------------------
def coord_att_ref(x, params, eps=1e-5):
    w1, b1, gamma, beta, rmean, rvar, w2, b2, w3, b3 = params
    n, c, h, w = x.shape
    xh = jnp.mean(x, axis=3)                                   # (N, C, H)
    xw = jnp.mean(x, axis=2)                                   # (N, C, W)
    y = jnp.concatenate([xh, xw], axis=2)                      # (N, C, H+W)
    y = jnp.einsum('mc,ncl->nml', w1, y) + b1[None]
    scale = gamma * lax.rsqrt(rvar + eps)
    shift = beta - rmean * scale
    y = y * scale[None] + shift[None]
    y = y * jnp.clip(y + 3.0, 0.0, 6.0) / 6.0
    ah = jax.nn.sigmoid(jnp.einsum('om,nmh->noh', w2, y[:, :, :h]) + b2[None])
    aw = jax.nn.sigmoid(jnp.einsum('om,nmw->now', w3, y[:, :, h:]) + b3[None])
    return x * aw[:, :, None, :] * ah[:, :, :, None]


if __name__ == "__main__":
    def make_case(key, n, c, h, w, dtype):
        groups = 32
        inp = oup = c                       # oup must equal inp for the final multiply
        mip = max(8, inp // groups)
        keys = jax.random.split(key, 11)
        x = jax.random.normal(keys[0], (n, c, h, w), jnp.float32).astype(dtype)
        w1 = 0.5 * jax.random.normal(keys[1], (mip, inp), jnp.float32)
        b1 = 0.1 * jax.random.normal(keys[2], (mip, 1), jnp.float32)
        gamma = 1.0 + 0.1 * jax.random.normal(keys[3], (mip, 1), jnp.float32)
        beta = 0.1 * jax.random.normal(keys[4], (mip, 1), jnp.float32)
        rmean = 0.1 * jax.random.normal(keys[5], (mip, 1), jnp.float32)
        rvar = 1.0 + 0.1 * jnp.abs(jax.random.normal(keys[6], (mip, 1), jnp.float32))
        w2 = 0.5 * jax.random.normal(keys[7], (oup, mip), jnp.float32)
        b2 = 0.1 * jax.random.normal(keys[8], (oup, 1), jnp.float32)
        w3 = 0.5 * jax.random.normal(keys[9], (oup, mip), jnp.float32)
        b3 = 0.1 * jax.random.normal(keys[10], (oup, 1), jnp.float32)
        params = (w1, b1, gamma, beta, rmean, rvar, w2, b2, w3, b3)
        return x, params

    def check(x, params, force_path, rtol, atol):
        out = coord_att(x, params, force_path=force_path)
        jax.block_until_ready(out)
        ref = coord_att_ref(x.astype(jnp.float32), params)
        assert out.shape == x.shape
        assert jnp.allclose(out.astype(jnp.float32), ref, rtol=rtol, atol=atol), (
            f"Pallas output mismatch vs reference (path={force_path}, dtype={x.dtype})")

    root = jax.random.PRNGKey(0)
    k0, k1 = jax.random.split(root)

    # Primary small case; exercise the auto path plus every explicit path.
    x, params = make_case(k0, 2, 4, 16, 16, jnp.float32)
    for path in (None, "flat", "reduce", "two_pass"):
        check(x, params, path, rtol=2e-3, atol=1e-5)

    # Non-square spatial map (catches H/W mix-ups in the indicator construction).
    x2, params2 = make_case(k1, 1, 8, 8, 24, jnp.float32)
    for path in ("flat", "reduce", "two_pass"):
        check(x2, params2, path, rtol=2e-3, atol=1e-5)

    # bf16 inputs: indicator / apply math runs at the narrow dtype (looser tolerance).
    xb = x.astype(jnp.bfloat16)
    check(xb, params, "flat", rtol=5e-2, atol=5e-2)
    check(xb, params, "reduce", rtol=5e-2, atol=5e-2)

    print("KERNEL_OK")
</pallas_src>

<mosaic_0001>
module attributes {stable_mosaic.version = 11 : i64} {
  func.func @_coordatt_flat_kernel(%arg0: i32, %arg1: memref<1x4x256xf32, #tpu.memory_space<vmem>>, %arg2: memref<32x256xf32, #tpu.memory_space<vmem>>, %arg3: memref<1x32xf32, #tpu.memory_space<vmem>>, %arg4: memref<8x4xf32, #tpu.memory_space<vmem>>, %arg5: memref<8x1xf32, #tpu.memory_space<vmem>>, %arg6: memref<4x8xf32, #tpu.memory_space<vmem>>, %arg7: memref<4x1xf32, #tpu.memory_space<vmem>>, %arg8: memref<4x8xf32, #tpu.memory_space<vmem>>, %arg9: memref<4x1xf32, #tpu.memory_space<vmem>>, %arg10: memref<1x4x256xf32, #tpu.memory_space<vmem>>) attributes {dimension_semantics = [#tpu.dimension_semantics<parallel>], iteration_bounds = array<i64: 2>, scalar_prefetch = 0 : i64, scratch_operands = 0 : i64, tpu.core_type = #tpu.core_type<tc>, window_params = [{transform_indices = @transform_0, window_bounds = array<i64: 1, 4, 256>}, {pipeline_mode = #tpu.pipeline_mode<synchronous>, transform_indices = @transform_1, window_bounds = array<i64: 32, 256>}, {pipeline_mode = #tpu.pipeline_mode<synchronous>, transform_indices = @transform_2, window_bounds = array<i64: 1, 32>}, {pipeline_mode = #tpu.pipeline_mode<synchronous>, transform_indices = @transform_3, window_bounds = array<i64: 8, 4>}, {pipeline_mode = #tpu.pipeline_mode<synchronous>, transform_indices = @transform_4, window_bounds = array<i64: 8, 1>}, {pipeline_mode = #tpu.pipeline_mode<synchronous>, transform_indices = @transform_5, window_bounds = array<i64: 4, 8>}, {pipeline_mode = #tpu.pipeline_mode<synchronous>, transform_indices = @transform_6, window_bounds = array<i64: 4, 1>}, {pipeline_mode = #tpu.pipeline_mode<synchronous>, transform_indices = @transform_7, window_bounds = array<i64: 4, 8>}, {pipeline_mode = #tpu.pipeline_mode<synchronous>, transform_indices = @transform_8, window_bounds = array<i64: 4, 1>}, {transform_indices = @transform_9, window_bounds = array<i64: 1, 4, 256>}]} {
    %c0 = arith.constant 0 : index
    %c0_0 = arith.constant 0 : index
    %c0_1 = arith.constant 0 : index
    %0 = vector.load %arg1[%c0, %c0_0, %c0_1] : memref<1x4x256xf32, #tpu.memory_space<vmem>>, vector<1x4x256xf32>
    %1 = vector.shape_cast %0 : vector<1x4x256xf32> to vector<4x256xf32>
    %c0_2 = arith.constant 0 : index
    %c0_3 = arith.constant 0 : index
    %2 = vector.load %arg2[%c0_2, %c0_3] : memref<32x256xf32, #tpu.memory_space<vmem>>, vector<32x256xf32>
    %cst = arith.constant dense<0.000000e+00> : vector<4x32xf32>
    %3 = tpu.matmul %1, %2, %cst {dimension_numbers = #tpu.dot_dimension_numbers<[1], [1], [0], [0], [0, 0, 1, 0], [], []>} : vector<4x256xf32>, vector<32x256xf32>, vector<4x32xf32> -> vector<4x32xf32>
    %c0_4 = arith.constant 0 : index
    %c0_5 = arith.constant 0 : index
    %4 = vector.load %arg3[%c0_4, %c0_5] : memref<1x32xf32, #tpu.memory_space<vmem>>, vector<1x32xf32>
    %5 = vector.broadcast %4 : vector<1x32xf32> to vector<4x32xf32>
    %6 = arith.mulf %3, %5 : vector<4x32xf32>
    %c0_6 = arith.constant 0 : index
    %c0_7 = arith.constant 0 : index
    %7 = vector.load %arg4[%c0_6, %c0_7] : memref<8x4xf32, #tpu.memory_space<vmem>>, vector<8x4xf32>
    %cst_8 = arith.constant dense<0.000000e+00> : vector<8x32xf32>
    %8 = tpu.matmul %7, %6, %cst_8 {dimension_numbers = #tpu.dot_dimension_numbers<[1], [0], [0], [1], [0, 0, 1, 1], [], []>} : vector<8x4xf32>, vector<4x32xf32>, vector<8x32xf32> -> vector<8x32xf32>
    %c0_9 = arith.constant 0 : index
    %c0_10 = arith.constant 0 : index
    %9 = vector.load %arg5[%c0_9, %c0_10] : memref<8x1xf32, #tpu.memory_space<vmem>>, vector<8x1xf32>
    %10 = vector.broadcast %9 : vector<8x1xf32> to vector<8x32xf32>
    %11 = arith.addf %8, %10 : vector<8x32xf32>
    %cst_11 = arith.constant 3.000000e+00 : f32
    %12 = vector.broadcast %cst_11 : f32 to vector<8x32xf32>
    %13 = arith.addf %11, %12 : vector<8x32xf32>
    %cst_12 = arith.constant 0.000000e+00 : f32
    %cst_13 = arith.constant 6.000000e+00 : f32
    %14 = vector.broadcast %cst_12 : f32 to vector<8x32xf32>
    %15 = arith.maximumf %14, %13 : vector<8x32xf32>
    %16 = vector.broadcast %cst_13 : f32 to vector<8x32xf32>
    %17 = arith.minimumf %16, %15 : vector<8x32xf32>
    %18 = arith.mulf %11, %17 : vector<8x32xf32>
    %cst_14 = arith.constant 0.166666672 : f32
    %19 = vector.broadcast %cst_14 : f32 to vector<8x32xf32>
    %20 = arith.mulf %18, %19 : vector<8x32xf32>
    %c0_15 = arith.constant 0 : index
    %c0_16 = arith.constant 0 : index
    %21 = vector.load %arg6[%c0_15, %c0_16] : memref<4x8xf32, #tpu.memory_space<vmem>>, vector<4x8xf32>
    %22 = vector.extract_strided_slice %20 {offsets = [0, 0], sizes = [8, 16], strides = [1, 1]} : vector<8x32xf32> to vector<8x16xf32>
    %cst_17 = arith.constant dense<0.000000e+00> : vector<4x16xf32>
    %23 = tpu.matmul %21, %22, %cst_17 {dimension_numbers = #tpu.dot_dimension_numbers<[1], [0], [0], [1], [0, 0, 1, 1], [], []>} : vector<4x8xf32>, vector<8x16xf32>, vector<4x16xf32> -> vector<4x16xf32>
    %c0_18 = arith.constant 0 : index
    %c0_19 = arith.constant 0 : index
    %24 = vector.load %arg7[%c0_18, %c0_19] : memref<4x1xf32, #tpu.memory_space<vmem>>, vector<4x1xf32>
    %25 = vector.broadcast %24 : vector<4x1xf32> to vector<4x16xf32>
    %26 = arith.addf %23, %25 : vector<4x16xf32>
    %cst_20 = arith.constant 5.000000e-01 : f32
    %27 = vector.broadcast %cst_20 : f32 to vector<4x16xf32>
    %28 = arith.mulf %27, %26 : vector<4x16xf32>
    %29 = math.tanh %28 : vector<4x16xf32>
    %cst_21 = arith.constant 5.000000e-01 : f32
    %30 = vector.broadcast %cst_21 : f32 to vector<4x16xf32>
    %31 = arith.mulf %30, %29 : vector<4x16xf32>
    %cst_22 = arith.constant 5.000000e-01 : f32
    %32 = vector.broadcast %cst_22 : f32 to vector<4x16xf32>
    %33 = arith.addf %31, %32 : vector<4x16xf32>
    %c0_23 = arith.constant 0 : index
    %c0_24 = arith.constant 0 : index
    %34 = vector.load %arg8[%c0_23, %c0_24] : memref<4x8xf32, #tpu.memory_space<vmem>>, vector<4x8xf32>
    %35 = vector.extract_strided_slice %20 {offsets = [0, 16], sizes = [8, 16], strides = [1, 1]} : vector<8x32xf32> to vector<8x16xf32>
    %cst_25 = arith.constant dense<0.000000e+00> : vector<4x16xf32>
    %36 = tpu.matmul %34, %35, %cst_25 {dimension_numbers = #tpu.dot_dimension_numbers<[1], [0], [0], [1], [0, 0, 1, 1], [], []>} : vector<4x8xf32>, vector<8x16xf32>, vector<4x16xf32> -> vector<4x16xf32>
    %c0_26 = arith.constant 0 : index
    %c0_27 = arith.constant 0 : index
    %37 = vector.load %arg9[%c0_26, %c0_27] : memref<4x1xf32, #tpu.memory_space<vmem>>, vector<4x1xf32>
    %38 = vector.broadcast %37 : vector<4x1xf32> to vector<4x16xf32>
    %39 = arith.addf %36, %38 : vector<4x16xf32>
    %cst_28 = arith.constant 5.000000e-01 : f32
    %40 = vector.broadcast %cst_28 : f32 to vector<4x16xf32>
    %41 = arith.mulf %40, %39 : vector<4x16xf32>
    %42 = math.tanh %41 : vector<4x16xf32>
    %cst_29 = arith.constant 5.000000e-01 : f32
    %43 = vector.broadcast %cst_29 : f32 to vector<4x16xf32>
    %44 = arith.mulf %43, %42 : vector<4x16xf32>
    %cst_30 = arith.constant 5.000000e-01 : f32
    %45 = vector.broadcast %cst_30 : f32 to vector<4x16xf32>
    %46 = arith.addf %44, %45 : vector<4x16xf32>
    %c0_31 = arith.constant 0 : index
    %c0_32 = arith.constant 0 : index
    %47 = vector.load %arg2[%c0_31, %c0_32] : memref<32x256xf32, #tpu.memory_space<vmem>>, vector<16x256xf32>
    %cst_33 = arith.constant dense<0.000000e+00> : vector<4x256xf32>
    %48 = tpu.matmul %33, %47, %cst_33 {dimension_numbers = #tpu.dot_dimension_numbers<[1], [0], [0], [1], [0, 0, 1, 1], [], []>} : vector<4x16xf32>, vector<16x256xf32>, vector<4x256xf32> -> vector<4x256xf32>
    %c16 = arith.constant 16 : index
    %c0_34 = arith.constant 0 : index
    %49 = vector.load %arg2[%c16, %c0_34] : memref<32x256xf32, #tpu.memory_space<vmem>>, vector<16x256xf32>
    %cst_35 = arith.constant dense<0.000000e+00> : vector<4x256xf32>
    %50 = tpu.matmul %46, %49, %cst_35 {dimension_numbers = #tpu.dot_dimension_numbers<[1], [0], [0], [1], [0, 0, 1, 1], [], []>} : vector<4x16xf32>, vector<16x256xf32>, vector<4x256xf32> -> vector<4x256xf32>
    %51 = arith.mulf %1, %50 : vector<4x256xf32>
    %52 = arith.mulf %51, %48 : vector<4x256xf32>
    %c0_36 = arith.constant 0 : index
    %c0_37 = arith.constant 0 : index
    %c0_38 = arith.constant 0 : index
    %53 = vector.load %arg10[%c0_36, %c0_37, %c0_38] : memref<1x4x256xf32, #tpu.memory_space<vmem>>, vector<1x4x256xf32>
    %54 = vector.shape_cast %53 : vector<1x4x256xf32> to vector<4x256xf32>
    %55 = vector.shape_cast %52 : vector<4x256xf32> to vector<1x4x256xf32>
    tpu.vector_store %arg10[%c0_36, %c0_37, %c0_38], %55 {strides = array<i32>} : memref<1x4x256xf32, #tpu.memory_space<vmem>>, vector<1x4x256xf32>,
    return
  }
  func.func @transform_0(%arg0: i32) -> (i32, i32, i32) {
    %c0_i32 = arith.constant 0 : i32
    %c0_i32_0 = arith.constant 0 : i32
    %c0_i32_1 = arith.constant 0 : i32
    return %arg0, %c0_i32, %c0_i32_0 : i32, i32, i32
  }
  func.func @transform_1(%arg0: i32) -> (i32, i32) {
    %c0_i32 = arith.constant 0 : i32
    %c0_i32_0 = arith.constant 0 : i32
    %c0_i32_1 = arith.constant 0 : i32
    return %c0_i32, %c0_i32_0 : i32, i32
  }
  func.func @transform_2(%arg0: i32) -> (i32, i32) {
    %c0_i32 = arith.constant 0 : i32
    %c0_i32_0 = arith.constant 0 : i32
    %c0_i32_1 = arith.constant 0 : i32
    return %c0_i32, %c0_i32_0 : i32, i32
  }
  func.func @transform_3(%arg0: i32) -> (i32, i32) {
    %c0_i32 = arith.constant 0 : i32
    %c0_i32_0 = arith.constant 0 : i32
    %c0_i32_1 = arith.constant 0 : i32
    return %c0_i32, %c0_i32_0 : i32, i32
  }
  func.func @transform_4(%arg0: i32) -> (i32, i32) {
    %c0_i32 = arith.constant 0 : i32
    %c0_i32_0 = arith.constant 0 : i32
    %c0_i32_1 = arith.constant 0 : i32
    return %c0_i32, %c0_i32_0 : i32, i32
  }
  func.func @transform_5(%arg0: i32) -> (i32, i32) {
    %c0_i32 = arith.constant 0 : i32
    %c0_i32_0 = arith.constant 0 : i32
    %c0_i32_1 = arith.constant 0 : i32
    return %c0_i32, %c0_i32_0 : i32, i32
  }
  func.func @transform_6(%arg0: i32) -> (i32, i32) {
    %c0_i32 = arith.constant 0 : i32
    %c0_i32_0 = arith.constant 0 : i32
    %c0_i32_1 = arith.constant 0 : i32
    return %c0_i32, %c0_i32_0 : i32, i32
  }
  func.func @transform_7(%arg0: i32) -> (i32, i32) {
    %c0_i32 = arith.constant 0 : i32
    %c0_i32_0 = arith.constant 0 : i32
    %c0_i32_1 = arith.constant 0 : i32
    return %c0_i32, %c0_i32_0 : i32, i32
  }
  func.func @transform_8(%arg0: i32) -> (i32, i32) {
    %c0_i32 = arith.constant 0 : i32
    %c0_i32_0 = arith.constant 0 : i32
    %c0_i32_1 = arith.constant 0 : i32
    return %c0_i32, %c0_i32_0 : i32, i32
  }
  func.func @transform_9(%arg0: i32) -> (i32, i32, i32) {
    %c0_i32 = arith.constant 0 : i32
    %c0_i32_0 = arith.constant 0 : i32
    %c0_i32_1 = arith.constant 0 : i32
    return %arg0, %c0_i32, %c0_i32_0 : i32, i32, i32
  }
}

module attributes {stable_mosaic.version = 11 : i64} {
  func.func @_coordatt_flat_kernel(%arg0: i32, %arg1: memref<1x4x256xf32, #tpu.memory_space<vmem>>, %arg2: memref<32x256xf32, #tpu.memory_space<vmem>>, %arg3: memref<1x32xf32, #tpu.memory_space<vmem>>, %arg4: memref<8x4xf32, #tpu.memory_space<vmem>>, %arg5: memref<8x1xf32, #tpu.memory_space<vmem>>, %arg6: memref<4x8xf32, #tpu.memory_space<vmem>>, %arg7: memref<4x1xf32, #tpu.memory_space<vmem>>, %arg8: memref<4x8xf32, #tpu.memory_space<vmem>>, %arg9: memref<4x1xf32, #tpu.memory_space<vmem>>, %arg10: memref<1x4x256xf32, #tpu.memory_space<vmem>>) attributes {dimension_semantics = [#tpu.dimension_semantics<parallel>], iteration_bounds = array<i64: 2>, scalar_prefetch = 0 : i64, scratch_operands = 0 : i64, tpu.core_type = #tpu.core_type<tc>, window_params = [{transform_indices = @transform_0, window_bounds = array<i64: 1, 4, 256>}, {pipeline_mode = #tpu.pipeline_mode<synchronous>, transform_indices = @transform_1, window_bounds = array<i64: 32, 256>}, {pipeline_mode = #tpu.pipeline_mode<synchronous>, transform_indices = @transform_2, window_bounds = array<i64: 1, 32>}, {pipeline_mode = #tpu.pipeline_mode<synchronous>, transform_indices = @transform_3, window_bounds = array<i64: 8, 4>}, {pipeline_mode = #tpu.pipeline_mode<synchronous>, transform_indices = @transform_4, window_bounds = array<i64: 8, 1>}, {pipeline_mode = #tpu.pipeline_mode<synchronous>, transform_indices = @transform_5, window_bounds = array<i64: 4, 8>}, {pipeline_mode = #tpu.pipeline_mode<synchronous>, transform_indices = @transform_6, window_bounds = array<i64: 4, 1>}, {pipeline_mode = #tpu.pipeline_mode<synchronous>, transform_indices = @transform_7, window_bounds = array<i64: 4, 8>}, {pipeline_mode = #tpu.pipeline_mode<synchronous>, transform_indices = @transform_8, window_bounds = array<i64: 4, 1>}, {transform_indices = @transform_9, window_bounds = array<i64: 1, 4, 256>}]} {
    %c0 = arith.constant 0 : index
    %c0_0 = arith.constant 0 : index
    %c0_1 = arith.constant 0 : index
    %0 = vector.load %arg1[%c0, %c0_0, %c0_1] : memref<1x4x256xf32, #tpu.memory_space<vmem>>, vector<1x4x256xf32>
    %1 = vector.shape_cast %0 : vector<1x4x256xf32> to vector<4x256xf32>
    %c0_2 = arith.constant 0 : index
    %c0_3 = arith.constant 0 : index
    %2 = vector.load %arg2[%c0_2, %c0_3] : memref<32x256xf32, #tpu.memory_space<vmem>>, vector<32x256xf32>
    %cst = arith.constant dense<0.000000e+00> : vector<4x32xf32>
    %3 = tpu.matmul %1, %2, %cst {dimension_numbers = #tpu.dot_dimension_numbers<[1], [1], [0], [0], [0, 0, 1, 0], [], []>} : vector<4x256xf32>, vector<32x256xf32>, vector<4x32xf32> -> vector<4x32xf32>
    %c0_4 = arith.constant 0 : index
    %c0_5 = arith.constant 0 : index
    %4 = vector.load %arg3[%c0_4, %c0_5] : memref<1x32xf32, #tpu.memory_space<vmem>>, vector<1x32xf32>
    %5 = vector.broadcast %4 : vector<1x32xf32> to vector<4x32xf32>
    %6 = arith.mulf %3, %5 : vector<4x32xf32>
    %c0_6 = arith.constant 0 : index
    %c0_7 = arith.constant 0 : index
    %7 = vector.load %arg4[%c0_6, %c0_7] : memref<8x4xf32, #tpu.memory_space<vmem>>, vector<8x4xf32>
    %cst_8 = arith.constant dense<0.000000e+00> : vector<8x32xf32>
    %8 = tpu.matmul %7, %6, %cst_8 {dimension_numbers = #tpu.dot_dimension_numbers<[1], [0], [0], [1], [0, 0, 1, 1], [], []>} : vector<8x4xf32>, vector<4x32xf32>, vector<8x32xf32> -> vector<8x32xf32>
    %c0_9 = arith.constant 0 : index
    %c0_10 = arith.constant 0 : index
    %9 = vector.load %arg5[%c0_9, %c0_10] : memref<8x1xf32, #tpu.memory_space<vmem>>, vector<8x1xf32>
    %10 = vector.broadcast %9 : vector<8x1xf32> to vector<8x32xf32>
    %11 = arith.addf %8, %10 : vector<8x32xf32>
    %cst_11 = arith.constant 3.000000e+00 : f32
    %12 = vector.broadcast %cst_11 : f32 to vector<8x32xf32>
    %13 = arith.addf %11, %12 : vector<8x32xf32>
    %cst_12 = arith.constant 0.000000e+00 : f32
    %cst_13 = arith.constant 6.000000e+00 : f32
    %14 = vector.broadcast %cst_12 : f32 to vector<8x32xf32>
    %15 = arith.maximumf %14, %13 : vector<8x32xf32>
    %16 = vector.broadcast %cst_13 : f32 to vector<8x32xf32>
    %17 = arith.minimumf %16, %15 : vector<8x32xf32>
    %18 = arith.mulf %11, %17 : vector<8x32xf32>
    %cst_14 = arith.constant 0.166666672 : f32
    %19 = vector.broadcast %cst_14 : f32 to vector<8x32xf32>
    %20 = arith.mulf %18, %19 : vector<8x32xf32>
    %c0_15 = arith.constant 0 : index
    %c0_16 = arith.constant 0 : index
    %21 = vector.load %arg6[%c0_15, %c0_16] : memref<4x8xf32, #tpu.memory_space<vmem>>, vector<4x8xf32>
    %22 = vector.extract_strided_slice %20 {offsets = [0, 0], sizes = [8, 16], strides = [1, 1]} : vector<8x32xf32> to vector<8x16xf32>
    %cst_17 = arith.constant dense<0.000000e+00> : vector<4x16xf32>
    %23 = tpu.matmul %21, %22, %cst_17 {dimension_numbers = #tpu.dot_dimension_numbers<[1], [0], [0], [1], [0, 0, 1, 1], [], []>} : vector<4x8xf32>, vector<8x16xf32>, vector<4x16xf32> -> vector<4x16xf32>
    %c0_18 = arith.constant 0 : index
    %c0_19 = arith.constant 0 : index
    %24 = vector.load %arg7[%c0_18, %c0_19] : memref<4x1xf32, #tpu.memory_space<vmem>>, vector<4x1xf32>
    %25 = vector.broadcast %24 : vector<4x1xf32> to vector<4x16xf32>
    %26 = arith.addf %23, %25 : vector<4x16xf32>
    %cst_20 = arith.constant 5.000000e-01 : f32
    %27 = vector.broadcast %cst_20 : f32 to vector<4x16xf32>
    %28 = arith.mulf %27, %26 : vector<4x16xf32>
    %29 = math.tanh %28 : vector<4x16xf32>
    %cst_21 = arith.constant 5.000000e-01 : f32
    %30 = vector.broadcast %cst_21 : f32 to vector<4x16xf32>
    %31 = arith.mulf %30, %29 : vector<4x16xf32>
    %cst_22 = arith.constant 5.000000e-01 : f32
    %32 = vector.broadcast %cst_22 : f32 to vector<4x16xf32>
    %33 = arith.addf %31, %32 : vector<4x16xf32>
    %c0_23 = arith.constant 0 : index
    %c0_24 = arith.constant 0 : index
    %34 = vector.load %arg8[%c0_23, %c0_24] : memref<4x8xf32, #tpu.memory_space<vmem>>, vector<4x8xf32>
    %35 = vector.extract_strided_slice %20 {offsets = [0, 16], sizes = [8, 16], strides = [1, 1]} : vector<8x32xf32> to vector<8x16xf32>
    %cst_25 = arith.constant dense<0.000000e+00> : vector<4x16xf32>
    %36 = tpu.matmul %34, %35, %cst_25 {dimension_numbers = #tpu.dot_dimension_numbers<[1], [0], [0], [1], [0, 0, 1, 1], [], []>} : vector<4x8xf32>, vector<8x16xf32>, vector<4x16xf32> -> vector<4x16xf32>
    %c0_26 = arith.constant 0 : index
    %c0_27 = arith.constant 0 : index
    %37 = vector.load %arg9[%c0_26, %c0_27] : memref<4x1xf32, #tpu.memory_space<vmem>>, vector<4x1xf32>
    %38 = vector.broadcast %37 : vector<4x1xf32> to vector<4x16xf32>
    %39 = arith.addf %36, %38 : vector<4x16xf32>
    %cst_28 = arith.constant 5.000000e-01 : f32
    %40 = vector.broadcast %cst_28 : f32 to vector<4x16xf32>
    %41 = arith.mulf %40, %39 : vector<4x16xf32>
    %42 = math.tanh %41 : vector<4x16xf32>
    %cst_29 = arith.constant 5.000000e-01 : f32
    %43 = vector.broadcast %cst_29 : f32 to vector<4x16xf32>
    %44 = arith.mulf %43, %42 : vector<4x16xf32>
    %cst_30 = arith.constant 5.000000e-01 : f32
    %45 = vector.broadcast %cst_30 : f32 to vector<4x16xf32>
    %46 = arith.addf %44, %45 : vector<4x16xf32>
    %c0_31 = arith.constant 0 : index
    %c0_32 = arith.constant 0 : index
    %47 = vector.load %arg2[%c0_31, %c0_32] : memref<32x256xf32, #tpu.memory_space<vmem>>, vector<16x256xf32>
    %cst_33 = arith.constant dense<0.000000e+00> : vector<4x256xf32>
    %48 = tpu.matmul %33, %47, %cst_33 {dimension_numbers = #tpu.dot_dimension_numbers<[1], [0], [0], [1], [0, 0, 1, 1], [], []>} : vector<4x16xf32>, vector<16x256xf32>, vector<4x256xf32> -> vector<4x256xf32>
    %c16 = arith.constant 16 : index
    %c0_34 = arith.constant 0 : index
    %49 = vector.load %arg2[%c16, %c0_34] : memref<32x256xf32, #tpu.memory_space<vmem>>, vector<16x256xf32>
    %cst_35 = arith.constant dense<0.000000e+00> : vector<4x256xf32>
    %50 = tpu.matmul %46, %49, %cst_35 {dimension_numbers = #tpu.dot_dimension_numbers<[1], [0], [0], [1], [0, 0, 1, 1], [], []>} : vector<4x16xf32>, vector<16x256xf32>, vector<4x256xf32> -> vector<4x256xf32>
    %51 = arith.mulf %1, %50 : vector<4x256xf32>
    %52 = arith.mulf %51, %48 : vector<4x256xf32>
    %c0_36 = arith.constant 0 : index
    %c0_37 = arith.constant 0 : index
    %c0_38 = arith.constant 0 : index
    %53 = vector.load %arg10[%c0_36, %c0_37, %c0_38] : memref<1x4x256xf32, #tpu.memory_space<vmem>>, vector<1x4x256xf32>
    %54 = vector.shape_cast %53 : vector<1x4x256xf32> to vector<4x256xf32>
    %55 = vector.shape_cast %52 : vector<4x256xf32> to vector<1x4x256xf32>
    tpu.vector_store %arg10[%c0_36, %c0_37, %c0_38], %55 {strides = array<i32>} : memref<1x4x256xf32, #tpu.memory_space<vmem>>, vector<1x4x256xf32>,
    return
  }
  func.func @transform_0(%arg0: i32) -> (i32, i32, i32) {
    %c0_i32 = arith.constant 0 : i32
    %c0_i32_0 = arith.constant 0 : i32
    %c0_i32_1 = arith.constant 0 : i32
    return %arg0, %c0_i32, %c0_i32_0 : i32, i32, i32
  }
  func.func @transform_1(%arg0: i32) -> (i32, i32) {
    %c0_i32 = arith.constant 0 : i32
    %c0_i32_0 = arith.constant 0 : i32
    %c0_i32_1 = arith.constant 0 : i32
    return %c0_i32, %c0_i32_0 : i32, i32
  }
  func.func @transform_2(%arg0: i32) -> (i32, i32) {
    %c0_i32 = arith.constant 0 : i32
    %c0_i32_0 = arith.constant 0 : i32
    %c0_i32_1 = arith.constant 0 : i32
    return %c0_i32, %c0_i32_0 : i32, i32
  }
  func.func @transform_3(%arg0: i32) -> (i32, i32) {
    %c0_i32 = arith.constant 0 : i32
    %c0_i32_0 = arith.constant 0 : i32
    %c0_i32_1 = arith.constant 0 : i32
    return %c0_i32, %c0_i32_0 : i32, i32
  }
  func.func @transform_4(%arg0: i32) -> (i32, i32) {
    %c0_i32 = arith.constant 0 : i32
    %c0_i32_0 = arith.constant 0 : i32
    %c0_i32_1 = arith.constant 0 : i32
    return %c0_i32, %c0_i32_0 : i32, i32
  }
  func.func @transform_5(%arg0: i32) -> (i32, i32) {
    %c0_i32 = arith.constant 0 : i32
    %c0_i32_0 = arith.constant 0 : i32
    %c0_i32_1 = arith.constant 0 : i32
    return %c0_i32, %c0_i32_0 : i32, i32
  }
  func.func @transform_6(%arg0: i32) -> (i32, i32) {
    %c0_i32 = arith.constant 0 : i32
    %c0_i32_0 = arith.constant 0 : i32
    %c0_i32_1 = arith.constant 0 : i32
    return %c0_i32, %c0_i32_0 : i32, i32
  }
  func.func @transform_7(%arg0: i32) -> (i32, i32) {
    %c0_i32 = arith.constant 0 : i32
    %c0_i32_0 = arith.constant 0 : i32
    %c0_i32_1 = arith.constant 0 : i32
    return %c0_i32, %c0_i32_0 : i32, i32
  }
  func.func @transform_8(%arg0: i32) -> (i32, i32) {
    %c0_i32 = arith.constant 0 : i32
    %c0_i32_0 = arith.constant 0 : i32
    %c0_i32_1 = arith.constant 0 : i32
    return %c0_i32, %c0_i32_0 : i32, i32
  }
  func.func @transform_9(%arg0: i32) -> (i32, i32, i32) {
    %c0_i32 = arith.constant 0 : i32
    %c0_i32_0 = arith.constant 0 : i32
    %c0_i32_1 = arith.constant 0 : i32
    return %arg0, %c0_i32, %c0_i32_0 : i32, i32, i32
  }
}

</mosaic_0001>

<bundles_post_ra>
// kernel: tpu_custom_call.1
= control target key start
LH: loop header
LB: loop body
LE: loop exit
PB: predicated region body
PF: predicated region fallthrough
CT: control target
= control target key end

     0   :  { %14 = vsyncpa [#allocation3], 0  ;;  %s1399_s0 = inlined_call_operand.vmem [shape: f32[2,4,256], index: 0, kind: input, shape index: {}]   ;;  %s1400_s1 = inlined_call_operand.hbm [shape: f32[32,256], index: 1, kind: input, shape index: {}]   ;;  %s1401_s2 = inlined_call_operand.vmem [shape: f32[1,32], index: 2, kind: input, shape index: {}]   ;;  %s1402_s3 = inlined_call_operand.vmem [shape: f32[8,4], index: 3, kind: input, shape index: {}]   ;;  %s1403_s4 = inlined_call_operand.vmem [shape: f32[8,1], index: 4, kind: input, shape index: {}]   ;;  %s1404_s5 = inlined_call_operand.vmem [shape: f32[4,8], index: 5, kind: input, shape index: {}]   ;;  %s1405_s6 = inlined_call_operand.vmem [shape: f32[4,1], index: 6, kind: input, shape index: {}]   ;;  %s1406_s7 = inlined_call_operand.vmem [shape: f32[4,8], index: 7, kind: input, shape index: {}]   ;;  %s1407_s8 = inlined_call_operand.vmem [shape: f32[4,1], index: 8, kind: input, shape index: {}]   ;;  %s1408_s9 = inlined_call_operand.hbm [shape: f32[2,4,256], index: 9, kind: output, shape index: {}]  }
   0x1   :  { %15 = vsyncpa [#allocation4], 0 }
   0x2   :  { %17 = vsyncpa [#allocation4 + $0x1], 0  ;;  %s1230_s30 = smov 0   ;;  %s1232_s10 = smov 0  }
   0x3   :  { %s1234_s11 = smov 0   ;;  %s1236_s12 = smov 0  }
   0x4 LB: > { %s1251_s13 = sadd.s32 4294967295, %s1170_s12   ;;  %s953_s14 = sadd.s32 4294967294, %s1170_s12   ;;  %s1170_s12 = sphi %s1236_s12, %s1424_s12   ;;  %s1166_s11 = sphi %s1234_s11, %s1423_s11   ;;  %s1162_s10 = sphi %s1232_s10, %s1422_s10   ;;  %s1158_s30 = sphi %s1230_s30, %s1421_s30  }
   0x5   : > { %s1255_s15 = sadd.s32 1, %s1170_s12   ;;  %s224_s16 = sadd.s32 1, %s1166_s11 }
   0x6   : > { %s221_s17 = ssub.s32 %s1170_s12, %s1255_s15  ;;  %p234_p0 = scmp.ne.s32.totalorder %s1166_s11, %s1162_s10 }
   0x7   : > { %p222_p1 = scmp.eq.s32.totalorder %s221_s17, 0  ;;  %p235_p2 = scmp.eq.s32.totalorder %s1251_s13, 1 }
   0x8   : > { %p240_p3 = scmp.ne.s32.totalorder %s1162_s10, %s1158_s30  ;;  %p241_p4 = scmp.eq.s32.totalorder %s953_s14, 1 }
   0x9   : > { %s1266_s18 = scalar_select %p222_p1, %s1166_s11, %s224_s16  }
   0xa   : > { %p1268_p5 = por %p235_p2, %p234_p0  ;;  %p1272_p6 = por %p241_p4, %p240_p3 }
   0xb   : > { %p954_p7 = scmp.ge.s32.totalorder %s1170_s12, 1  ;;  %p248_p8 = scmp.lt.s32.totalorder %s1170_s12, 3 }
   0xc   : > { %s1412_s19 = scalar_select %p1268_p5, 1, 0 }
   0xd   : > { %s1413_s20 = scalar_select %p1272_p6, 1, 0 }
   0xe   : > { %p1409_p9 = scmp.eq.s32.totalorder %s1251_s13, 0  ;;  %p1279_p10 = pnand %p954_p7, %p248_p8 }
   0xf   : > { %s1172_s22 = smov [#allocation2]   ;;  %s1076_s27 = scalar_lea.hbm %s1400_s1, 1024 }
  0x10   : > { %s1414_s21 = scalar_select %p1279_p10, 1, 0 }
  0x11   : > { %s260_s23 = sshll.u32 %s1172_s22, 4  ;;  %p1019_p11 = pneg %p1279_p10  ;;  %s261_s23 = int_to_ptr.vmem [resolvable:$true] %s260_s23 }
  0x12   : > { %p1077_p13 = scmp.ne.s32.totalorder %s1400_s1, %s1076_s27  ;;  %p1083_p3 = scmp.lt.u32.totalorder %s1076_s27, %s1400_s1 }
  0x13   : > { %p1287_p12 = pnand %p1409_p9, %p1019_p11 }
  0x15   : > { %p1078_p0 = pneg %p1287_p12 }
  0x17   : > { %p1079_p1 = pnand %p1078_p0, %p1077_p13 }
  0x19   : > { %p1080_p2 = pneg %p1079_p1 }
  0x1b   : > { %p1085_p4 = pnand %p1083_p3, %p1080_p2 }
  0x1d   : > { %1088 = shalt.err (!%p1085_p4)
}
  0x1e   : > { %s1089_s17 = scalar_lea.vmem %s261_s23, 1024  ;;  %p1097_p9 = scmp.lt.s32.totalorder %s261_s23, %s261_s23 }
  0x1f   : > { %p1090_p7 = scmp.ne.s32.totalorder %s261_s23, %s1089_s17  ;;  %p1098_p6 = scmp.lt.s32.totalorder %s1089_s17, %s1089_s17 }
  0x21   : > { %p1092_p8 = pnand %p1090_p7, %p1078_p0  ;;  %p1099_p5 = por %p1098_p6, %p1097_p9 }
  0x23   : > { %p1093_p11 = pneg %p1092_p8 }
  0x25   : > { %p1100_p10 = pnand %p1099_p5, %p1093_p11 }
  0x27   : > { %1103 = shalt.err (!%p1100_p10)
}
  0x28   : > { %s1173_s22 = smov 256   ;;  %s1174_s25 = smov 16  }
  0x29   : > { %1022 = dma.hbm_to_vmem [thread:$0]  (!%p1287_p12), %s1400_s1, 1024, %s261_s23, [#allocation3], %s1173_s22, %s1173_s22, %s1174_s25  }
  0x2a   : > { %p1416_p13 = scmp.ne.s32.totalorder %s1414_s21, 0 }
  0x2b   : > { %p1417_p1 = scmp.eq.s32.totalorder (!%p1416_p13), %s1251_s13, 0 }
  0x2c   : > { %305 = sbr.rel (%p1416_p13) target bundleno = 1090 (0x442), region = 56 }
  0x33   : > { %1149 = dma.done.wait (%p1417_p1), [#allocation3], 1024   ;;  %p1418_p0 = pmov %p1417_p1 }
  0x34   : > { %p341_p5 = scmp.lt.s32.totalorder %s1251_s13, 1  ;;  %v348_v0 = vld [vmem:[#allocation2 + $0x8] sm:$0xff]  ;;  %v350_v1 = vld [vmem:[#allocation2 + $0x18] sm:$0xff]  ;;  %v347_v2 = vld [vmem:[#allocation2] sm:$0xff]  ;;  %v1175_v14 = vmov 0.0   ;;  %vm1176_vm0 = vmmov 0  }
  0x35   : > { %1151 = vsyncadd (%p1418_p0), [#allocation3], 4294966272  ;;  %v997_v3 = vpack.c.bf16 %v350_v1, %v348_v0  ;;  %v349_v4 = vld [vmem:[#allocation2 + $0x10] sm:$0xff]  ;;  %v352_v5 = vld [vmem:[#allocation2 + $0x28] sm:$0xff]  ;;  %982 = vmatprep.subr.mxu1 %v1175_v14  ;;  %984 = vmatprep.mubr.msk.f32.mxu1 %vm1176_vm0, %v1175_v14  ;;  %v1177_v16 = vmov 0   ;;  %vm447_vm1 = vcmask 1043456  }
  0x36   : > { %s342_s27 = scalar_select %p341_p5, %s1251_s13, 1  ;;  %v354_v6 = vld [vmem:[#allocation2 + $0x38] sm:$0xff]  ;;  %v999_v7 = vpack.c.bf16 %v349_v4, %v347_v2  ;;  %v351_v11 = vld [vmem:[#allocation2 + $0x20] sm:$0xff]  ;;  %v353_v12 = vld [vmem:[#allocation2 + $0x30] sm:$0xff]  ;;  %1069 = vset.pattern.permute.xlu0 %v1177_v16  ;;  %1070 = vset.pattern.permute.xlu1 %v1177_v16  ;;  %vm443_vm2 = vcmask 31744   ;;  %vm533_vm3 = vcmask 64512  }
  0x37   : > { %v1001_v8 = vpack.c.bf16 %v354_v6, %v352_v5  ;;  %998 = vmatprep.subr.bf16.mxu0 %v997_v3  ;;  %v1322_v13 = vpack.c.bf16 %v353_v12, %v351_v11  ;;  %v437_v15 = vld [vmem:[%s1403_s4] sm:$0xff]  ;;  %s1178_s21 = smov 112   ;;  %vm703_vm4 = vcmask 130048   ;;  %s338_s22 = sand.u32 1, %s1162_s10  }
  0x38   : > { %s974_s29 = sshll.u32 %s342_s27, 3  ;;  %1000 = vmatpush1.bf16.xpose.msra.mxu0 %v999_v7  ;;  %440 = vperm.xlu0 %1069, %v437_v15   ;;  %v962_v17 = vld [vmem:[%s1401_s2] ss:$0 sm:$0xff]  ;;  %s959_s25 = sshll.u32 %s338_s22, 3 }
  0x39   : > { %s345_s16 = scalar_lea.vmem %s1399_s0, %s974_s29  ;;  %1002 = vmatprep.subr.bf16.mxu0 %v1001_v8  ;;  %v436_v21 = vld [vmem:[%s1402_s3] sm:$0xff]  ;;  %s975_s26 = sshll.u32 %s1251_s13, 7 }
  0x3a   : > { %v1318_v9 = vld [vmem:[%s345_s16] sm:$0xff]  ;;  %s340_s28 = scalar_lea.vmem [#allocation5], %s959_s25  ;;  %s1357_s24 = scalar_lea.hbm %s1408_s9, %s975_s26 }
  0x3b   : > { %v356_v10 = vcombine.high %v1318_v9, %v1318_v9  ;;  %v527_v26 = vld [vmem:[%s1405_s6] sm:$0xf]  ;;  %s882_s27 = sshll.u32 %s340_s28, 4  ;;  %s868_s16 = scalar_lea.sflag [#allocation4], %s338_s22  ;;  %s1359_s27 = int_to_ptr.vmem [resolvable:$true] %s882_s27 }
  0x3c   : > { %530 = vperm.xlu1 %1070, %v527_v26   ;;  %v612_v28 = vld [vmem:[%s1407_s8] sm:$0xf]  ;;  %p1419_p9 = scmp.ne.s32.totalorder %s1412_s19, 0  ;;  %s1179_s13 = smov [#allocation5]  }
  0x3d   : > { %422 = vmatprep.mubr.f32.mxu0 %v356_v10  ;;  %v526_v33 = vld [vmem:[%s1404_s5] sm:$0xf]  ;;  %s1108_s23 = sshll.u32 %s1179_s13, 4  ;;  %s1109_s23 = int_to_ptr.vmem [resolvable:$false] %s1108_s23 }
  0x3e   : > { %v611_v34 = vld [vmem:[%s1406_s7] sm:$0xf]  ;;  %s1110_s17 = scalar_lea.vmem %s1109_s23, 256  ;;  %p1111_p2 = scmp.lt.s32.totalorder %s1359_s27, %s1109_s23 }
  0x40   : > { %1004 = vmatpush1.bf16.xpose.msra.mxu0 %v1322_v13  ;;  %615 = vperm.xlu1 %1070, %v612_v28  }
  0x47   : > { %423 = vmatmul.mubr.f32.vlgmr.msra.gmra.mrb[0].mxu0 %v1318_v9 }
  0xb7   : > { %v441_v22 = vpop.permute.xlu0 %440 }
  0xbb   : > { %v531_v36 = vpop.permute.xlu1 %530 }
  0xbf   : > { %v616_v44 = vpop.permute.xlu1 %615 }
 0x11a   : > { %v424_v18 = vpop.f32.mrb[0].mxu0 }
 0x11b   : > { %v435_v19 = vmul.f32 %v962_v17, %v424_v18  ;;  %v426_v20 = vpop.f32.mrb[1].mxu0 }
 0x11d   : > { %983 = vmatpush3.msk.msra.mxu1 %vm447_vm1, %v435_v19 }
 0x11e   : > { %985 = vmatmul.mubr.msk.f32.vlgmr.msra.gmra.mrb[0].mxu1 %vm443_vm2, %v436_v21  ;;  %987 = vmatprep.subr.mxu1 %v1175_v14 }
 0x11f   : > { %989 = vmatprep.mubr.msk.f32.mxu1 %vm1176_vm0, %v1175_v14 }
 0x1f1   : > { %v517_v23 = vpop.f32.mrb[0].mxu1 }
 0x1f2   : > { %v518_v24 = vadd.f32 %v517_v23, %v441_v22  ;;  %v986_v25 = vpop.f32.mrb[1].mxu1 }
 0x1f4   : > { %v521_v27 = vadd.f32 3.0, %v518_v24 }
 0x1f6   : > { %v522_v29 = vmax.f32 %v521_v27, 0.0 }
 0x1f8   : > { %v523_v30 = vmin.f32 %v522_v29, 6.0 }
 0x1fa   : > { %v524_v31 = vmul.f32 %v523_v30, %v518_v24 }
 0x1fc   : > { %v525_v32 = vmul.f32 0.16666667, %v524_v31 }
 0x1fe   : > { %619 = vrot.lane.b32.xlu0 %v525_v32, %s1178_s21  ;;  %988 = vmatpush3.msra.mxu1 %v525_v32  ;;  %s1104_s21 = scalar_lea.vmem %s1359_s27, 128 }
 0x1ff   : > { %990 = vmatmul.mubr.msk.f32.vlgmr.msra.gmra.mrb[2].mxu1 %vm533_vm3, %v526_v33  ;;  %992 = vmatprep.subr.mxu1 %v1175_v14  ;;  %p1105_p6 = scmp.ne.s32.totalorder %s1359_s27, %s1104_s21  ;;  %p1112_p3 = scmp.lt.s32.totalorder %s1110_s17, %s1104_s21 }
 0x200   : > { %994 = vmatprep.mubr.msk.f32.mxu1 %vm1176_vm0, %v1175_v14 }
 0x201   : > { %p1106_p10 = pnand %p1105_p6, %p1419_p9  ;;  %p1113_p4 = por %p1112_p3, %p1111_p2 }
 0x203   : > { %p1107_p12 = pneg %p1106_p10 }
 0x205   : > { %p1114_p7 = pnand %p1113_p4, %p1107_p12 }
 0x270   : > { %v620_v35 = vpop.permute.xlu0 %619 }
 0x271   : > { %993 = vmatpush3.msra.mxu1 %v620_v35 }
 0x272   : > { %995 = vmatmul.mubr.msk.f32.vlgmr.msra.gmra.mrb[4].mxu1 %vm533_vm3, %v611_v34  ;;  %1006 = vmatprep.subr.bf16.mxu1 %v997_v3 }
 0x273   : > { %1008 = vmatpush1.bf16.msra.mxu1 %v999_v7  ;;  %771 = vmatprep.mubr.f32.mxu1 %v1175_v14 }
 0x274   : > { %1010 = vmatprep.subr.bf16.mxu1 %v1001_v8 }
 0x2d2   : > { %v603_v37 = vpop.f32.mrb[2].mxu1 }
 0x2d3   : > { %v604_v38 = vadd.f32 %v603_v37, %v531_v36  ;;  %v991_v39 = vpop.f32.mrb[3].mxu1 }
 0x2d5   : > { %v607_v40 = vmul.f32 0.5, %v604_v38 }
 0x2d7   : > { %1072 = vtanh.f32 %v607_v40 }
 0x2e1   : > { %v1073_v41 = vpop.eup %1072 }
 0x2e2   : > { %v609_v42 = vmul.f32 0.5, %v1073_v41 }
 0x2e4   : > { %v610_v43 = vadd.f32 0.5, %v609_v42 }
 0x2e6   : > { %967 = vmatmul.mubr.msk.f32.vlgmr.msra.gmra.mrb[6].mxu1 %vm703_vm4, %v610_v43 }
 0x2e7   : > { %1012 = vmatpush1.bf16.msra.mxu1 %v1322_v13  ;;  %849 = vmatprep.mubr.f32.mxu1 %v1175_v14 }
 0x345   : > { %v691_v45 = vpop.f32.mrb[4].mxu1 }
 0x346   : > { %v692_v46 = vadd.f32 %v691_v45, %v616_v44  ;;  %v996_v47 = vpop.f32.mrb[5].mxu1 }
 0x348   : > { %v695_v48 = vmul.f32 0.5, %v692_v46 }
 0x34a   : > { %1074 = vtanh.f32 %v695_v48 }
 0x354   : > { %v1075_v49 = vpop.eup %1074 }
 0x355   : > { %v697_v50 = vmul.f32 0.5, %v1075_v49 }
 0x357   : > { %v698_v51 = vadd.f32 0.5, %v697_v50 }
 0x359   : > { %968 = vmatmul.mubr.msk.f32.vlgmr.msra.gmra.mrb[8].mxu1 %vm703_vm4, %v698_v51 }
 0x3b9   : > { %v773_v52 = vpop.f32.mrb[6].mxu1 }
 0x3ba   : > { %v775_v53 = vpop.f32.mrb[7].mxu1 }
 0x3bb   : > { %v863_v54 = vcombine.low %v773_v52, %v775_v53 }
 0x42c   : > { %v851_v55 = vpop.f32.mrb[8].mxu1 }
 0x42d   : > { %v853_v56 = vpop.f32.mrb[9].mxu1 }
 0x42e   : > { %v858_v57 = vcombine.low %v851_v55, %v853_v56 }
 0x430   : > { %v860_v58 = vmul.f32 %v858_v57, %v1318_v9 }
 0x432   : > { %v865_v59 = vmul.f32 %v863_v54, %v860_v58 }
 0x434   : > { %866 = vst [vmem:[%s340_s28] sm:$0xff] %v865_v59 }
 0x435   : > { %1117 = shalt.err (!%p1114_p7)
}
 0x436   : > { %s1118_s22 = scalar_lea.hbm %s1357_s24, 128  ;;  %s1122_s28 = scalar_lea.hbm %s1408_s9, 256 }
 0x437   : > { %p1119_p8 = scmp.ne.s32.totalorder %s1357_s24, %s1118_s22  ;;  %p1123_p1 = scmp.lt.u32.totalorder %s1357_s24, %s1408_s9 }
 0x438   : > { %p1124_p0 = scmp.lt.u32.totalorder %s1122_s28, %s1118_s22  ;;  %p1126_p6 = scmp.lt.u32.totalorder %s1118_s22, %s1357_s24 }
 0x439   : > { %p1120_p11 = pnand %p1119_p8, %p1419_p9 }
 0x43a   : > { %p1125_p5 = por %p1124_p0, %p1123_p1 }
 0x43b   : > { %p1121_p13 = pneg %p1120_p11 }
 0x43c   : > { %p1127_p10 = por %p1126_p6, %p1125_p5 }
 0x43e   : > { %p1128_p12 = pnand %p1127_p10, %p1121_p13 }
 0x440   : > { %1131 = shalt.err (!%p1128_p12)
}
 0x441   : > { %1017 = dma.vmem_to_hbm [thread:$0]  (%p1419_p9), %s1359_s27, 128, %s1357_s24, %s868_s16  }
 0x442 PF: > { %p1029_p2 = scmp.ge.s32.totalorder %s1170_s12, 2  ;;  %s894_s21 = sand.u32 1, %s1158_s30  }
 0x443   : > { %p1420_p3 = scmp.ne.s32.totalorder %s1413_s20, 0  ;;  %s895_s13 = scalar_lea.sflag [#allocation4], %s894_s21 }
 0x445   : > { %p1024_p4 = pnand %p1029_p2, %p1420_p3 }
 0x447   : > { %1153 = dma.done.wait (!%p1024_p4), %s895_s13, 128  }
 0x448   : > { %1155 = vsyncadd (!%p1024_p4), %s895_s13, 4294967168  ;;  %p20_p7 = scmp.ge.s32.totalorder %s1255_s15, 4   ;;  %s1421_s30 = smov %s1162_s10 }
 0x449   : > { %s1422_s10 = smov %s1166_s11  ;;  %s1423_s11 = smov %s1266_s18 }
 0x44a   : > { %s1424_s12 = smov %s1255_s15  ;;  %22 = sbr.rel (!%p20_p7) target bundleno = 4 (0x4), region = 96 }
 0x451   :  { %900 = vsyncpa [#allocation3], 1 }
 0x452   :  { %902 = vsyncpa [#allocation3 + $0x1], 1 }
 0x453   :  { %903 = vsyncpa [#allocation4], 1 }
 0x454   :  { %905 = vsyncpa [#allocation4 + $0x1], 1 }

// kernel: tpu_custom_call.1
= control target key start
LH: loop header
LB: loop body
LE: loop exit
PB: predicated region body
PF: predicated region fallthrough
CT: control target
= control target key end

     0   :  { %14 = vsyncpa [#allocation3], 0  ;;  %s1399_s0 = inlined_call_operand.vmem [shape: f32[2,4,256], index: 0, kind: input, shape index: {}]   ;;  %s1400_s1 = inlined_call_operand.hbm [shape: f32[32,256], index: 1, kind: input, shape index: {}]   ;;  %s1401_s2 = inlined_call_operand.vmem [shape: f32[1,32], index: 2, kind: input, shape index: {}]   ;;  %s1402_s3 = inlined_call_operand.vmem [shape: f32[8,4], index: 3, kind: input, shape index: {}]   ;;  %s1403_s4 = inlined_call_operand.vmem [shape: f32[8,1], index: 4, kind: input, shape index: {}]   ;;  %s1404_s5 = inlined_call_operand.vmem [shape: f32[4,8], index: 5, kind: input, shape index: {}]   ;;  %s1405_s6 = inlined_call_operand.vmem [shape: f32[4,1], index: 6, kind: input, shape index: {}]   ;;  %s1406_s7 = inlined_call_operand.vmem [shape: f32[4,8], index: 7, kind: input, shape index: {}]   ;;  %s1407_s8 = inlined_call_operand.vmem [shape: f32[4,1], index: 8, kind: input, shape index: {}]   ;;  %s1408_s9 = inlined_call_operand.hbm [shape: f32[2,4,256], index: 9, kind: output, shape index: {}]  }
   0x1   :  { %15 = vsyncpa [#allocation4], 0 }
   0x2   :  { %17 = vsyncpa [#allocation4 + $0x1], 0  ;;  %s1230_s30 = smov 0   ;;  %s1232_s10 = smov 0  }
   0x3   :  { %s1234_s11 = smov 0   ;;  %s1236_s12 = smov 0  }
   0x4 LB: > { %s1251_s13 = sadd.s32 4294967295, %s1170_s12   ;;  %s953_s14 = sadd.s32 4294967294, %s1170_s12   ;;  %s1170_s12 = sphi %s1236_s12, %s1424_s12   ;;  %s1166_s11 = sphi %s1234_s11, %s1423_s11   ;;  %s1162_s10 = sphi %s1232_s10, %s1422_s10   ;;  %s1158_s30 = sphi %s1230_s30, %s1421_s30  }
   0x5   : > { %s1255_s15 = sadd.s32 1, %s1170_s12   ;;  %s224_s16 = sadd.s32 1, %s1166_s11 }
   0x6   : > { %s221_s17 = ssub.s32 %s1170_s12, %s1255_s15  ;;  %p234_p0 = scmp.ne.s32.totalorder %s1166_s11, %s1162_s10 }
   0x7   : > { %p222_p1 = scmp.eq.s32.totalorder %s221_s17, 0  ;;  %p235_p2 = scmp.eq.s32.totalorder %s1251_s13, 1 }
   0x8   : > { %p240_p3 = scmp.ne.s32.totalorder %s1162_s10, %s1158_s30  ;;  %p241_p4 = scmp.eq.s32.totalorder %s953_s14, 1 }
   0x9   : > { %s1266_s18 = scalar_select %p222_p1, %s1166_s11, %s224_s16  }
   0xa   : > { %p1268_p5 = por %p235_p2, %p234_p0  ;;  %p1272_p6 = por %p241_p4, %p240_p3 }
   0xb   : > { %p954_p7 = scmp.ge.s32.totalorder %s1170_s12, 1  ;;  %p248_p8 = scmp.lt.s32.totalorder %s1170_s12, 3 }
   0xc   : > { %s1412_s19 = scalar_select %p1268_p5, 1, 0 }
   0xd   : > { %s1413_s20 = scalar_select %p1272_p6, 1, 0 }
   0xe   : > { %p1409_p9 = scmp.eq.s32.totalorder %s1251_s13, 0  ;;  %p1279_p10 = pnand %p954_p7, %p248_p8 }
   0xf   : > { %s1172_s22 = smov [#allocation2]   ;;  %s1076_s27 = scalar_lea.hbm %s1400_s1, 1024 }
  0x10   : > { %s1414_s21 = scalar_select %p1279_p10, 1, 0 }
  0x11   : > { %s260_s23 = sshll.u32 %s1172_s22, 4  ;;  %p1019_p11 = pneg %p1279_p10  ;;  %s261_s23 = int_to_ptr.vmem [resolvable:$true] %s260_s23 }
  0x12   : > { %p1077_p13 = scmp.ne.s32.totalorder %s1400_s1, %s1076_s27  ;;  %p1083_p3 = scmp.lt.u32.totalorder %s1076_s27, %s1400_s1 }
  0x13   : > { %p1287_p12 = pnand %p1409_p9, %p1019_p11 }
  0x15   : > { %p1078_p0 = pneg %p1287_p12 }
  0x17   : > { %p1079_p1 = pnand %p1078_p0, %p1077_p13 }
  0x19   : > { %p1080_p2 = pneg %p1079_p1 }
  0x1b   : > { %p1085_p4 = pnand %p1083_p3, %p1080_p2 }
  0x1d   : > { %1088 = shalt.err (!%p1085_p4)
}
  0x1e   : > { %s1089_s17 = scalar_lea.vmem %s261_s23, 1024  ;;  %p1097_p9 = scmp.lt.s32.totalorder %s261_s23, %s261_s23 }
  0x1f   : > { %p1090_p7 = scmp.ne.s32.totalorder %s261_s23, %s1089_s17  ;;  %p1098_p6 = scmp.lt.s32.totalorder %s1089_s17, %s1089_s17 }
  0x21   : > { %p1092_p8 = pnand %p1090_p7, %p1078_p0  ;;  %p1099_p5 = por %p1098_p6, %p1097_p9 }
  0x23   : > { %p1093_p11 = pneg %p1092_p8 }
  0x25   : > { %p1100_p10 = pnand %p1099_p5, %p1093_p11 }
  0x27   : > { %1103 = shalt.err (!%p1100_p10)
}
  0x28   : > { %s1173_s22 = smov 256   ;;  %s1174_s25 = smov 16  }
  0x29   : > { %1022 = dma.hbm_to_vmem [thread:$0]  (!%p1287_p12), %s1400_s1, 1024, %s261_s23, [#allocation3], %s1173_s22, %s1173_s22, %s1174_s25  }
  0x2a   : > { %p1416_p13 = scmp.ne.s32.totalorder %s1414_s21, 0 }
  0x2b   : > { %p1417_p1 = scmp.eq.s32.totalorder (!%p1416_p13), %s1251_s13, 0 }
  0x2c   : > { %305 = sbr.rel (%p1416_p13) target bundleno = 1090 (0x442), region = 56 }
  0x33   : > { %1149 = dma.done.wait (%p1417_p1), [#allocation3], 1024   ;;  %p1418_p0 = pmov %p1417_p1 }
  0x34   : > { %p341_p5 = scmp.lt.s32.totalorder %s1251_s13, 1  ;;  %v348_v0 = vld [vmem:[#allocation2 + $0x8] sm:$0xff]  ;;  %v350_v1 = vld [vmem:[#allocation2 + $0x18] sm:$0xff]  ;;  %v347_v2 = vld [vmem:[#allocation2] sm:$0xff]  ;;  %v1175_v14 = vmov 0.0   ;;  %vm1176_vm0 = vmmov 0  }
  0x35   : > { %1151 = vsyncadd (%p1418_p0), [#allocation3], 4294966272  ;;  %v997_v3 = vpack.c.bf16 %v350_v1, %v348_v0  ;;  %v349_v4 = vld [vmem:[#allocation2 + $0x10] sm:$0xff]  ;;  %v352_v5 = vld [vmem:[#allocation2 + $0x28] sm:$0xff]  ;;  %982 = vmatprep.subr.mxu1 %v1175_v14  ;;  %984 = vmatprep.mubr.msk.f32.mxu1 %vm1176_vm0, %v1175_v14  ;;  %v1177_v16 = vmov 0   ;;  %vm447_vm1 = vcmask 1043456  }
  0x36   : > { %s342_s27 = scalar_select %p341_p5, %s1251_s13, 1  ;;  %v354_v6 = vld [vmem:[#allocation2 + $0x38] sm:$0xff]  ;;  %v999_v7 = vpack.c.bf16 %v349_v4, %v347_v2  ;;  %v351_v11 = vld [vmem:[#allocation2 + $0x20] sm:$0xff]  ;;  %v353_v12 = vld [vmem:[#allocation2 + $0x30] sm:$0xff]  ;;  %1069 = vset.pattern.permute.xlu0 %v1177_v16  ;;  %1070 = vset.pattern.permute.xlu1 %v1177_v16  ;;  %vm443_vm2 = vcmask 31744   ;;  %vm533_vm3 = vcmask 64512  }
  0x37   : > { %v1001_v8 = vpack.c.bf16 %v354_v6, %v352_v5  ;;  %998 = vmatprep.subr.bf16.mxu0 %v997_v3  ;;  %v1322_v13 = vpack.c.bf16 %v353_v12, %v351_v11  ;;  %v437_v15 = vld [vmem:[%s1403_s4] sm:$0xff]  ;;  %s1178_s21 = smov 112   ;;  %vm703_vm4 = vcmask 130048   ;;  %s338_s22 = sand.u32 1, %s1162_s10  }
  0x38   : > { %s974_s29 = sshll.u32 %s342_s27, 3  ;;  %1000 = vmatpush1.bf16.xpose.msra.mxu0 %v999_v7  ;;  %440 = vperm.xlu0 %1069, %v437_v15   ;;  %v962_v17 = vld [vmem:[%s1401_s2] ss:$0 sm:$0xff]  ;;  %s959_s25 = sshll.u32 %s338_s22, 3 }
  0x39   : > { %s345_s16 = scalar_lea.vmem %s1399_s0, %s974_s29  ;;  %1002 = vmatprep.subr.bf16.mxu0 %v1001_v8  ;;  %v436_v21 = vld [vmem:[%s1402_s3] sm:$0xff]  ;;  %s975_s26 = sshll.u32 %s1251_s13, 7 }
  0x3a   : > { %v1318_v9 = vld [vmem:[%s345_s16] sm:$0xff]  ;;  %s340_s28 = scalar_lea.vmem [#allocation5], %s959_s25  ;;  %s1357_s24 = scalar_lea.hbm %s1408_s9, %s975_s26 }
  0x3b   : > { %v356_v10 = vcombine.high %v1318_v9, %v1318_v9  ;;  %v527_v26 = vld [vmem:[%s1405_s6] sm:$0xf]  ;;  %s882_s27 = sshll.u32 %s340_s28, 4  ;;  %s868_s16 = scalar_lea.sflag [#allocation4], %s338_s22  ;;  %s1359_s27 = int_to_ptr.vmem [resolvable:$true] %s882_s27 }
  0x3c   : > { %530 = vperm.xlu1 %1070, %v527_v26   ;;  %v612_v28 = vld [vmem:[%s1407_s8] sm:$0xf]  ;;  %p1419_p9 = scmp.ne.s32.totalorder %s1412_s19, 0  ;;  %s1179_s13 = smov [#allocation5]  }
  0x3d   : > { %422 = vmatprep.mubr.f32.mxu0 %v356_v10  ;;  %v526_v33 = vld [vmem:[%s1404_s5] sm:$0xf]  ;;  %s1108_s23 = sshll.u32 %s1179_s13, 4  ;;  %s1109_s23 = int_to_ptr.vmem [resolvable:$false] %s1108_s23 }
  0x3e   : > { %v611_v34 = vld [vmem:[%s1406_s7] sm:$0xf]  ;;  %s1110_s17 = scalar_lea.vmem %s1109_s23, 256  ;;  %p1111_p2 = scmp.lt.s32.totalorder %s1359_s27, %s1109_s23 }
  0x40   : > { %1004 = vmatpush1.bf16.xpose.msra.mxu0 %v1322_v13  ;;  %615 = vperm.xlu1 %1070, %v612_v28  }
  0x47   : > { %423 = vmatmul.mubr.f32.vlgmr.msra.gmra.mrb[0].mxu0 %v1318_v9 }
  0xb7   : > { %v441_v22 = vpop.permute.xlu0 %440 }
  0xbb   : > { %v531_v36 = vpop.permute.xlu1 %530 }
  0xbf   : > { %v616_v44 = vpop.permute.xlu1 %615 }
 0x11a   : > { %v424_v18 = vpop.f32.mrb[0].mxu0 }
 0x11b   : > { %v435_v19 = vmul.f32 %v962_v17, %v424_v18  ;;  %v426_v20 = vpop.f32.mrb[1].mxu0 }
 0x11d   : > { %983 = vmatpush3.msk.msra.mxu1 %vm447_vm1, %v435_v19 }
 0x11e   : > { %985 = vmatmul.mubr.msk.f32.vlgmr.msra.gmra.mrb[0].mxu1 %vm443_vm2, %v436_v21  ;;  %987 = vmatprep.subr.mxu1 %v1175_v14 }
 0x11f   : > { %989 = vmatprep.mubr.msk.f32.mxu1 %vm1176_vm0, %v1175_v14 }
 0x1f1   : > { %v517_v23 = vpop.f32.mrb[0].mxu1 }
 0x1f2   : > { %v518_v24 = vadd.f32 %v517_v23, %v441_v22  ;;  %v986_v25 = vpop.f32.mrb[1].mxu1 }
 0x1f4   : > { %v521_v27 = vadd.f32 3.0, %v518_v24 }
 0x1f6   : > { %v522_v29 = vmax.f32 %v521_v27, 0.0 }
 0x1f8   : > { %v523_v30 = vmin.f32 %v522_v29, 6.0 }
 0x1fa   : > { %v524_v31 = vmul.f32 %v523_v30, %v518_v24 }
 0x1fc   : > { %v525_v32 = vmul.f32 0.16666667, %v524_v31 }
 0x1fe   : > { %619 = vrot.lane.b32.xlu0 %v525_v32, %s1178_s21  ;;  %988 = vmatpush3.msra.mxu1 %v525_v32  ;;  %s1104_s21 = scalar_lea.vmem %s1359_s27, 128 }
 0x1ff   : > { %990 = vmatmul.mubr.msk.f32.vlgmr.msra.gmra.mrb[2].mxu1 %vm533_vm3, %v526_v33  ;;  %992 = vmatprep.subr.mxu1 %v1175_v14  ;;  %p1105_p6 = scmp.ne.s32.totalorder %s1359_s27, %s1104_s21  ;;  %p1112_p3 = scmp.lt.s32.totalorder %s1110_s17, %s1104_s21 }
 0x200   : > { %994 = vmatprep.mubr.msk.f32.mxu1 %vm1176_vm0, %v1175_v14 }
 0x201   : > { %p1106_p10 = pnand %p1105_p6, %p1419_p9  ;;  %p1113_p4 = por %p1112_p3, %p1111_p2 }
 0x203   : > { %p1107_p12 = pneg %p1106_p10 }
 0x205   : > { %p1114_p7 = pnand %p1113_p4, %p1107_p12 }
 0x270   : > { %v620_v35 = vpop.permute.xlu0 %619 }
 0x271   : > { %993 = vmatpush3.msra.mxu1 %v620_v35 }
 0x272   : > { %995 = vmatmul.mubr.msk.f32.vlgmr.msra.gmra.mrb[4].mxu1 %vm533_vm3, %v611_v34  ;;  %1006 = vmatprep.subr.bf16.mxu1 %v997_v3 }
 0x273   : > { %1008 = vmatpush1.bf16.msra.mxu1 %v999_v7  ;;  %771 = vmatprep.mubr.f32.mxu1 %v1175_v14 }
 0x274   : > { %1010 = vmatprep.subr.bf16.mxu1 %v1001_v8 }
 0x2d2   : > { %v603_v37 = vpop.f32.mrb[2].mxu1 }
 0x2d3   : > { %v604_v38 = vadd.f32 %v603_v37, %v531_v36  ;;  %v991_v39 = vpop.f32.mrb[3].mxu1 }
 0x2d5   : > { %v607_v40 = vmul.f32 0.5, %v604_v38 }
 0x2d7   : > { %1072 = vtanh.f32 %v607_v40 }
 0x2e1   : > { %v1073_v41 = vpop.eup %1072 }
 0x2e2   : > { %v609_v42 = vmul.f32 0.5, %v1073_v41 }
 0x2e4   : > { %v610_v43 = vadd.f32 0.5, %v609_v42 }
 0x2e6   : > { %967 = vmatmul.mubr.msk.f32.vlgmr.msra.gmra.mrb[6].mxu1 %vm703_vm4, %v610_v43 }
 0x2e7   : > { %1012 = vmatpush1.bf16.msra.mxu1 %v1322_v13  ;;  %849 = vmatprep.mubr.f32.mxu1 %v1175_v14 }
 0x345   : > { %v691_v45 = vpop.f32.mrb[4].mxu1 }
 0x346   : > { %v692_v46 = vadd.f32 %v691_v45, %v616_v44  ;;  %v996_v47 = vpop.f32.mrb[5].mxu1 }
 0x348   : > { %v695_v48 = vmul.f32 0.5, %v692_v46 }
 0x34a   : > { %1074 = vtanh.f32 %v695_v48 }
 0x354   : > { %v1075_v49 = vpop.eup %1074 }
 0x355   : > { %v697_v50 = vmul.f32 0.5, %v1075_v49 }
 0x357   : > { %v698_v51 = vadd.f32 0.5, %v697_v50 }
 0x359   : > { %968 = vmatmul.mubr.msk.f32.vlgmr.msra.gmra.mrb[8].mxu1 %vm703_vm4, %v698_v51 }
 0x3b9   : > { %v773_v52 = vpop.f32.mrb[6].mxu1 }
 0x3ba   : > { %v775_v53 = vpop.f32.mrb[7].mxu1 }
 0x3bb   : > { %v863_v54 = vcombine.low %v773_v52, %v775_v53 }
 0x42c   : > { %v851_v55 = vpop.f32.mrb[8].mxu1 }
 0x42d   : > { %v853_v56 = vpop.f32.mrb[9].mxu1 }
 0x42e   : > { %v858_v57 = vcombine.low %v851_v55, %v853_v56 }
 0x430   : > { %v860_v58 = vmul.f32 %v858_v57, %v1318_v9 }
 0x432   : > { %v865_v59 = vmul.f32 %v863_v54, %v860_v58 }
 0x434   : > { %866 = vst [vmem:[%s340_s28] sm:$0xff] %v865_v59 }
 0x435   : > { %1117 = shalt.err (!%p1114_p7)
}
 0x436   : > { %s1118_s22 = scalar_lea.hbm %s1357_s24, 128  ;;  %s1122_s28 = scalar_lea.hbm %s1408_s9, 256 }
 0x437   : > { %p1119_p8 = scmp.ne.s32.totalorder %s1357_s24, %s1118_s22  ;;  %p1123_p1 = scmp.lt.u32.totalorder %s1357_s24, %s1408_s9 }
 0x438   : > { %p1124_p0 = scmp.lt.u32.totalorder %s1122_s28, %s1118_s22  ;;  %p1126_p6 = scmp.lt.u32.totalorder %s1118_s22, %s1357_s24 }
 0x439   : > { %p1120_p11 = pnand %p1119_p8, %p1419_p9 }
 0x43a   : > { %p1125_p5 = por %p1124_p0, %p1123_p1 }
 0x43b   : > { %p1121_p13 = pneg %p1120_p11 }
 0x43c   : > { %p1127_p10 = por %p1126_p6, %p1125_p5 }
 0x43e   : > { %p1128_p12 = pnand %p1127_p10, %p1121_p13 }
 0x440   : > { %1131 = shalt.err (!%p1128_p12)
}
 0x441   : > { %1017 = dma.vmem_to_hbm [thread:$0]  (%p1419_p9), %s1359_s27, 128, %s1357_s24, %s868_s16  }
 0x442 PF: > { %p1029_p2 = scmp.ge.s32.totalorder %s1170_s12, 2  ;;  %s894_s21 = sand.u32 1, %s1158_s30  }
 0x443   : > { %p1420_p3 = scmp.ne.s32.totalorder %s1413_s20, 0  ;;  %s895_s13 = scalar_lea.sflag [#allocation4], %s894_s21 }
 0x445   : > { %p1024_p4 = pnand %p1029_p2, %p1420_p3 }
 0x447   : > { %1153 = dma.done.wait (!%p1024_p4), %s895_s13, 128  }
 0x448   : > { %1155 = vsyncadd (!%p1024_p4), %s895_s13, 4294967168  ;;  %p20_p7 = scmp.ge.s32.totalorder %s1255_s15, 4   ;;  %s1421_s30 = smov %s1162_s10 }
 0x449   : > { %s1422_s10 = smov %s1166_s11  ;;  %s1423_s11 = smov %s1266_s18 }
 0x44a   : > { %s1424_s12 = smov %s1255_s15  ;;  %22 = sbr.rel (!%p20_p7) target bundleno = 4 (0x4), region = 96 }
 0x451   :  { %900 = vsyncpa [#allocation3], 1 }
 0x452   :  { %902 = vsyncpa [#allocation3 + $0x1], 1 }
 0x453   :  { %903 = vsyncpa [#allocation4], 1 }
 0x454   :  { %905 = vsyncpa [#allocation4 + $0x1], 1 }

</bundles_post_ra>
